<compile_context>
chip_gen: v7x
topology: tpu7x:2x2x1
jax: 0.10.0
libtpu: 0.0.40
codegen_flags: <defaults>
</compile_context>

<pallas_src>
import math
from functools import partial

import jax
import jax.numpy as jnp
import numpy as np
from jax import lax
from jax.experimental import pallas as pl
from jax.experimental.pallas import tpu as pltpu


# --------------------------------------------------------------------------
# Pass 1: QKV projection -> head-major (B, H, S, hd) bf16, Q pre-scaled.
# --------------------------------------------------------------------------
def _qkv_proj_kernel(x_ref, wqkv_ref, bqkv_ref, q_ref, k_ref, v_ref,
                     *, nhead, head_dim, scale):
    TS = x_ref.shape[0]
    D = nhead * head_dim
    xf = x_ref[...].astype(jnp.bfloat16)
    qkv = jnp.dot(xf, wqkv_ref[...], preferred_element_type=jnp.float32)
    qkv = qkv + bqkv_ref[...]
    qs = qkv[:, :D] * scale                         # fold log2(e)/sqrt(hd) into Q
    ks = qkv[:, D:2 * D]
    vs = qkv[:, 2 * D:]
    # One XLU transpose per tile (instead of H masked sub-stores).
    q_ref[...] = jnp.swapaxes(qs.reshape(TS, nhead, head_dim), 0, 1).astype(jnp.bfloat16)
    k_ref[...] = jnp.swapaxes(ks.reshape(TS, nhead, head_dim), 0, 1).astype(jnp.bfloat16)
    v_ref[...] = jnp.swapaxes(vs.reshape(TS, nhead, head_dim), 0, 1).astype(jnp.bfloat16)


# --------------------------------------------------------------------------
# Pass 2: flash attention + output projection + FFN + LayerNorms (post-norm).
# --------------------------------------------------------------------------
def _attn_ffn_kernel(
    kvlen_ref,                                  # SMEM (B,) int32 — valid key length per batch
    x_ref,                                      # (TQ, D)     f32 residual tile
    q_ref,                                      # (H, TQ, hd) bf16 (pre-scaled by log2e/sqrt(hd))
    k_ref, v_ref,                               # (H, S, hd)  bf16
    validq_ref,                                 # (TQ, 1)     f32, 1.0 = valid query row
    kbias_ref,                                  # (NKV, TK)   f32 additive key bias (0 / -1e9)
    wo_ref, bo_ref,                             # (D, D) bf16 , (1, D) f32
    w1_ref, b1_ref,                             # (D, dff) bf16 , (1, dff) f32
    w2_ref, b2_ref,                             # (dff, D) bf16 , (1, D) f32
    g1_ref, beta1_ref, g2_ref, beta2_ref,       # (1, D) f32
    out_ref,                                    # (TQ, D)
    acc_scr,                                    # (H, TQ, hd) f32 scratch
    *, nhead, head_dim, kv_tile, eps):

    H, hd, TK = nhead, head_dim, kv_tile
    D = H * hd
    TQ = x_ref.shape[0]
    b = pl.program_id(0)

    # ------- flash attention: online softmax (log2 domain) over KV tiles -------
    acc_scr[...] = jnp.zeros_like(acc_scr)
    kv_len = kvlen_ref[b]
    num_kv = jnp.maximum((kv_len + TK - 1) // TK, 1)   # skip all-pad trailing tiles

    q_h = q_ref[...]                                    # (H, TQ, hd) bf16

    def kv_step(t, carry):
        m_prev, l_prev = carry                          # (H, TQ, 1) f32 vreg carries
        start = pl.multiple_of(t * TK, TK)
        k_t = k_ref[:, pl.ds(start, TK), :]             # (H, TK, hd) bf16
        v_t = v_ref[:, pl.ds(start, TK), :]
        kb = kbias_ref[pl.ds(t, 1), :].reshape(1, 1, TK)

        s = lax.dot_general(q_h, k_t, (((2,), (2,)), ((0,), (0,))),
                            preferred_element_type=jnp.float32)   # (H, TQ, TK)
        s = s + kb

        m_new = jnp.maximum(m_prev, jnp.max(s, axis=-1, keepdims=True))
        alpha = jnp.exp2(m_prev - m_new)
        p = jnp.exp2(s - m_new)
        l_new = alpha * l_prev + jnp.sum(p, axis=-1, keepdims=True)
        pv = lax.dot_general(p.astype(jnp.bfloat16), v_t,
                             (((2,), (1,)), ((0,), (0,))),
                             preferred_element_type=jnp.float32)  # (H, TQ, hd)
        acc_scr[...] = alpha * acc_scr[...] + pv
        return (m_new, l_new)

    m0 = jnp.full((H, TQ, 1), -jnp.inf, jnp.float32)
    l0 = jnp.zeros((H, TQ, 1), jnp.float32)
    _, l_f = lax.fori_loop(0, num_kv, kv_step, (m0, l0))

    ctx = acc_scr[...] * pl.reciprocal(l_f, approx=True)          # (H, TQ, hd) f32
    # FlashMHA zero-pads attention outputs at padded query rows (before out-proj).
    ctx = ctx * validq_ref[...][None, :, :]
    # head-major -> row-major once, then a single D-deep output projection.
    ctx = jnp.swapaxes(ctx, 0, 1).reshape(TQ, D).astype(jnp.bfloat16)
    attn_out = jnp.dot(ctx, wo_ref[...], preferred_element_type=jnp.float32)
    attn_out = attn_out + bo_ref[...]

    # ------- residual + LayerNorm1 (post-norm, one-pass stats, f32) -------
    x_tile = x_ref[...].astype(jnp.float32)
    h1 = x_tile + attn_out                                        # dropout1 = identity
    mu = jnp.mean(h1, axis=-1, keepdims=True)
    ms = jnp.mean(h1 * h1, axis=-1, keepdims=True)
    h1 = (h1 - mu) * lax.rsqrt(ms - mu * mu + eps) * g1_ref[...] + beta1_ref[...]

    # ------- feed-forward (relu), bf16 MXU with f32 accumulation -------
    ff = jnp.dot(h1.astype(jnp.bfloat16), w1_ref[...],
                 preferred_element_type=jnp.float32) + b1_ref[...]
    ff = jnp.maximum(ff, 0.0).astype(jnp.bfloat16)                # dropout = identity
    ff = jnp.dot(ff, w2_ref[...], preferred_element_type=jnp.float32) + b2_ref[...]

    # ------- residual + LayerNorm2 -------
    h2 = h1 + ff                                                  # dropout2 = identity
    mu2 = jnp.mean(h2, axis=-1, keepdims=True)
    ms2 = jnp.mean(h2 * h2, axis=-1, keepdims=True)
    out = (h2 - mu2) * lax.rsqrt(ms2 - mu2 * mu2 + eps) * g2_ref[...] + beta2_ref[...]

    out_ref[...] = out.astype(out_ref.dtype)


def _pick_tile(n, target):
    """Largest tile <= target that divides n and is a multiple of 8 (else n)."""
    if n <= target:
        return n
    for t in range(target, 7, -1):
        if t % 8 == 0 and n % t == 0:
            return t
    return n


def flash_transformer_encoder_layer(src, src_key_padding_mask, params, *,
                                    nhead, layer_norm_eps=1e-5,
                                    seq_tile=256, q_tile=256, kv_tile=128):
    """src: (B, S, D) float32; src_key_padding_mask: (B, S) bool, True = PAD."""
    B, S, D = src.shape
    hd = D // nhead
    dff = params['w1_t'].shape[1]
    TS = _pick_tile(S, seq_tile)
    TQ = _pick_tile(S, q_tile)
    TK = _pick_tile(S, kv_tile)
    n_s, n_q, n_kv = S // TS, S // TQ, S // TK

    # Module semantics: an all-False mask is dropped entirely, which is
    # numerically identical to the all-valid mask used here.
    valid = jnp.logical_not(src_key_padding_mask)
    valid_f = valid.astype(jnp.float32)                               # (B, S)
    valid_q = valid_f[:, :, None]                                     # (B, S, 1)
    k_bias = ((valid_f - 1.0) * 1e9).reshape(B, n_kv, TK)             # (B, NKV, TK)
    # 1 + index of last valid key (0 if fully padded) -> trailing KV tiles skipped.
    kv_len = jnp.max(jnp.where(valid, jnp.arange(S, dtype=jnp.int32) + 1, 0),
                     axis=1).astype(jnp.int32)                        # (B,)

    # bf16 weights for the MXU; biases / LayerNorm params stay f32.
    wqkv_b = params['wqkv_t'].astype(jnp.bfloat16)
    wo_b = params['wo_t'].astype(jnp.bfloat16)
    w1_b = params['w1_t'].astype(jnp.bfloat16)
    w2_b = params['w2_t'].astype(jnp.bfloat16)

    log2e = math.log2(math.e)

    # ---------------- pass 1: QKV projection ----------------
    const2 = lambda b, s: (0, 0)
    qkv_kernel = partial(_qkv_proj_kernel, nhead=nhead, head_dim=hd,
                         scale=log2e / math.sqrt(hd))
    qkv_shape = jax.ShapeDtypeStruct((B, nhead, S, hd), jnp.bfloat16)
    qkv_out_spec = pl.BlockSpec((None, nhead, TS, hd), lambda b, s: (b, 0, s, 0))

    q_hm, k_hm, v_hm = pl.pallas_call(
        qkv_kernel,
        out_shape=(qkv_shape, qkv_shape, qkv_shape),
        grid_spec=pltpu.PrefetchScalarGridSpec(
            num_scalar_prefetch=0,
            grid=(B, n_s),
            in_specs=[
                pl.BlockSpec((None, TS, D), lambda b, s: (b, s, 0)),
                pl.BlockSpec((D, 3 * D), const2, pipeline_mode=pl.Buffered(1)),
                pl.BlockSpec((1, 3 * D), const2, pipeline_mode=pl.Buffered(1)),
            ],
            out_specs=(qkv_out_spec, qkv_out_spec, qkv_out_spec),
        ),
        compiler_params=pltpu.CompilerParams(
            dimension_semantics=("parallel", "parallel")),
    )(src, wqkv_b, params['bqkv'])

    # ---------------- pass 2: attention + FFN + LayerNorms ----------------
    kernel = partial(_attn_ffn_kernel, nhead=nhead, head_dim=hd,
                     kv_tile=TK, eps=layer_norm_eps)

    cshared = lambda b, j, kl: (0, 0)
    def wspec(shape):   # constant-index operand: no point double-buffering it
        return pl.BlockSpec(shape, cshared, pipeline_mode=pl.Buffered(1))

    in_specs = [
        pl.BlockSpec((None, TQ, D), lambda b, j, kl: (b, j, 0)),            # x residual tile
        pl.BlockSpec((None, nhead, TQ, hd), lambda b, j, kl: (b, 0, j, 0)), # Q tile
        pl.BlockSpec((None, nhead, S, hd), lambda b, j, kl: (b, 0, 0, 0)),  # K (full seq of b)
        pl.BlockSpec((None, nhead, S, hd), lambda b, j, kl: (b, 0, 0, 0)),  # V (full seq of b)
        pl.BlockSpec((None, TQ, 1), lambda b, j, kl: (b, j, 0)),            # query-valid mask
        pl.BlockSpec((None, n_kv, TK), lambda b, j, kl: (b, 0, 0)),         # key bias tiles
        wspec((D, D)), wspec((1, D)),                                       # Wo^T, b_o
        wspec((D, dff)), wspec((1, dff)),                                   # W1^T, b1
        wspec((dff, D)), wspec((1, D)),                                     # W2^T, b2
        wspec((1, D)), wspec((1, D)),                                       # norm1 gamma/beta
        wspec((1, D)), wspec((1, D)),                                       # norm2 gamma/beta
    ]

    flops = int(B * (4 * nhead * S * S * hd                  # qk^T + pv
                     + 2 * S * D * D                         # output projection
                     + 4 * S * D * dff))                     # ffn
    bytes_accessed = int(2 * B * S * D * 4                   # x in + out (f32)
                         + B * S * D * 2                     # Q (bf16)
                         + 2 * B * n_q * S * D * 2           # K+V re-read per q tile (bf16)
                         + (D * D + 2 * D * dff) * 2         # bf16 weights
                         + 2 * B * S * 4)                    # masks
    cost = pl.CostEstimate(flops=flops,
                           transcendentals=int(B * nhead * S * S),
                           bytes_accessed=bytes_accessed)

    return pl.pallas_call(
        kernel,
        out_shape=jax.ShapeDtypeStruct((B, S, D), src.dtype),
        grid_spec=pltpu.PrefetchScalarGridSpec(
            num_scalar_prefetch=1,
            grid=(B, n_q),
            in_specs=in_specs,
            out_specs=pl.BlockSpec((None, TQ, D), lambda b, j, kl: (b, j, 0)),
            scratch_shapes=[pltpu.VMEM((nhead, TQ, hd), jnp.float32)],  # ctx accumulator
        ),
        compiler_params=pltpu.CompilerParams(
            dimension_semantics=("parallel", "parallel"),
            vmem_limit_bytes=48 * 1024 * 1024),
        cost_estimate=cost,
    )(kv_len, src, q_hm, k_hm, v_hm, valid_q, k_bias,
      wo_b, params['bo'], w1_b, params['b1'], w2_b, params['b2'],
      params['g1'], params['beta1'], params['g2'], params['beta2'])


def init_params(key, d_model, nhead, dim_feedforward):
    ks = jax.random.split(key, 12)
    s = 0.05
    wqkv = jax.random.normal(ks[0], (3 * d_model, d_model), jnp.float32) * s
    bqkv = jax.random.normal(ks[1], (3 * d_model,), jnp.float32) * s
    wo = jax.random.normal(ks[2], (d_model, d_model), jnp.float32) * s
    bo = jax.random.normal(ks[3], (d_model,), jnp.float32) * s
    w1 = jax.random.normal(ks[4], (dim_feedforward, d_model), jnp.float32) * s
    b1 = jax.random.normal(ks[5], (dim_feedforward,), jnp.float32) * s
    w2 = jax.random.normal(ks[6], (d_model, dim_feedforward), jnp.float32) * s
    b2 = jax.random.normal(ks[7], (d_model,), jnp.float32) * s
    g1 = 1.0 + 0.1 * jax.random.normal(ks[8], (d_model,), jnp.float32)
    beta1 = 0.1 * jax.random.normal(ks[9], (d_model,), jnp.float32)
    g2 = 1.0 + 0.1 * jax.random.normal(ks[10], (d_model,), jnp.float32)
    beta2 = 0.1 * jax.random.normal(ks[11], (d_model,), jnp.float32)
    # Transposed weights (in, out) so kernel does x @ W_t + b (PyTorch y = x W^T + b).
    return dict(
        wqkv_t=wqkv.T, bqkv=bqkv.reshape(1, -1),
        wo_t=wo.T, bo=bo.reshape(1, -1),
        w1_t=w1.T, b1=b1.reshape(1, -1),
        w2_t=w2.T, b2=b2.reshape(1, -1),
        g1=g1.reshape(1, -1), beta1=beta1.reshape(1, -1),
        g2=g2.reshape(1, -1), beta2=beta2.reshape(1, -1),
    )


def reference(src, pad_mask, p, nhead, eps=1e-5):
    """Pure-JAX f32 replica of the PyTorch forward (post-norm, eval mode)."""
    B, S, D = src.shape
    hd = D // nhead
    valid = jnp.where(pad_mask, 0.0, 1.0)

    def layernorm(h, g, b):
        mu = jnp.mean(h, axis=-1, keepdims=True)
        var = jnp.mean((h - mu) ** 2, axis=-1, keepdims=True)
        return (h - mu) * lax.rsqrt(var + eps) * g + b

    qkv = src @ p['wqkv_t'] + p['bqkv']
    q = qkv[..., :D].reshape(B, S, nhead, hd)
    k = qkv[..., D:2 * D].reshape(B, S, nhead, hd)
    v = qkv[..., 2 * D:].reshape(B, S, nhead, hd)
    scores = jnp.einsum('bshd,bthd->bhst', q, k) / math.sqrt(hd)
    scores = scores + ((valid - 1.0) * 1e9)[:, None, None, :]
    attn = jax.nn.softmax(scores, axis=-1)
    ctx = jnp.einsum('bhst,bthd->bshd', attn, v).reshape(B, S, D)
    ctx = ctx * valid[..., None]
    attn_out = ctx @ p['wo_t'] + p['bo']
    h = layernorm(src + attn_out, p['g1'], p['beta1'])
    ff = jnp.maximum(h @ p['w1_t'] + p['b1'], 0.0) @ p['w2_t'] + p['b2']
    return layernorm(h + ff, p['g2'], p['beta2'])


if __name__ == "__main__":
    B, S, D, NHEAD, DFF = 2, 16, 32, 4, 64

    key = jax.random.PRNGKey(0)
    k_x, k_p = jax.random.split(key)
    src = jax.random.normal(k_x, (B, S, D), jnp.float32)
    # True = padding token (PyTorch convention).
    # Batch 1: last 9 tokens padded (exercises KV-tile skipping).
    # Batch 0: one interior padded token (exercises general mask handling).
    pad = jnp.zeros((B, S), jnp.bool_)
    pad = pad.at[1, S - 9:].set(True)
    pad = pad.at[0, 3].set(True)

    params = init_params(k_p, D, NHEAD, DFF)

    # Small tiles so the test exercises multiple seq / query / KV tiles.
    out = flash_transformer_encoder_layer(src, pad, params, nhead=NHEAD,
                                          seq_tile=8, q_tile=8, kv_tile=8)
    out = jax.block_until_ready(out)

    ref = jax.block_until_ready(reference(src, pad, params, NHEAD))
    assert out.shape == (B, S, D)
    assert np.allclose(np.asarray(out), np.asarray(ref), atol=5e-2, rtol=5e-2), \
        "Pallas output mismatch vs pure-JAX reference"

    print("KERNEL_OK")
</pallas_src>

<mosaic_0001>
module attributes {stable_mosaic.version = 11 : i64} {
  func.func @_qkv_proj_kernel(%arg0: i32, %arg1: i32, %arg2: memref<1x8x32xf32, #tpu.memory_space<vmem>>, %arg3: memref<32x96xbf16, #tpu.memory_space<vmem>>, %arg4: memref<1x96xf32, #tpu.memory_space<vmem>>, %arg5: memref<1x4x8x8xbf16, #tpu.memory_space<vmem>>, %arg6: memref<1x4x8x8xbf16, #tpu.memory_space<vmem>>, %arg7: memref<1x4x8x8xbf16, #tpu.memory_space<vmem>>) attributes {dimension_semantics = [#tpu.dimension_semantics<parallel>, #tpu.dimension_semantics<parallel>], iteration_bounds = array<i64: 2, 2>, scalar_prefetch = 0 : i64, scratch_operands = 0 : i64, tpu.core_type = #tpu.core_type<tc>, window_params = [{transform_indices = @transform_0, window_bounds = array<i64: 1, 8, 32>}, {pipeline_mode = #tpu.pipeline_mode<synchronous>, transform_indices = @transform_1, window_bounds = array<i64: 32, 96>}, {pipeline_mode = #tpu.pipeline_mode<synchronous>, transform_indices = @transform_2, window_bounds = array<i64: 1, 96>}, {transform_indices = @transform_3, window_bounds = array<i64: 1, 4, 8, 8>}, {transform_indices = @transform_4, window_bounds = array<i64: 1, 4, 8, 8>}, {transform_indices = @transform_5, window_bounds = array<i64: 1, 4, 8, 8>}]} {
    %c0 = arith.constant 0 : index
    %c0_0 = arith.constant 0 : index
    %c0_1 = arith.constant 0 : index
    %0 = vector.load %arg2[%c0, %c0_0, %c0_1] : memref<1x8x32xf32, #tpu.memory_space<vmem>>, vector<1x8x32xf32>
    %1 = vector.shape_cast %0 : vector<1x8x32xf32> to vector<8x32xf32>
    %2 = arith.truncf %1 : vector<8x32xf32> to vector<8x32xbf16>
    %c0_2 = arith.constant 0 : index
    %c0_3 = arith.constant 0 : index
    %3 = vector.load %arg3[%c0_2, %c0_3] : memref<32x96xbf16, #tpu.memory_space<vmem>>, vector<32x96xbf16>
    %cst = arith.constant dense<0.000000e+00> : vector<8x96xf32>
    %4 = tpu.matmul %2, %3, %cst {dimension_numbers = #tpu.dot_dimension_numbers<[1], [0], [0], [1], [0, 0, 1, 1], [], []>} : vector<8x32xbf16>, vector<32x96xbf16>, vector<8x96xf32> -> vector<8x96xf32>
    %c0_4 = arith.constant 0 : index
    %c0_5 = arith.constant 0 : index
    %5 = vector.load %arg4[%c0_4, %c0_5] : memref<1x96xf32, #tpu.memory_space<vmem>>, vector<1x96xf32>
    %6 = vector.broadcast %5 : vector<1x96xf32> to vector<8x96xf32>
    %7 = arith.addf %4, %6 : vector<8x96xf32>
    %8 = vector.extract_strided_slice %7 {offsets = [0, 0], sizes = [8, 32], strides = [1, 1]} : vector<8x96xf32> to vector<8x32xf32>
    %cst_6 = arith.constant 0.510069728 : f32
    %9 = vector.broadcast %cst_6 : f32 to vector<8x32xf32>
    %10 = arith.mulf %8, %9 : vector<8x32xf32>
    %11 = vector.extract_strided_slice %7 {offsets = [0, 32], sizes = [8, 32], strides = [1, 1]} : vector<8x96xf32> to vector<8x32xf32>
    %12 = vector.extract_strided_slice %7 {offsets = [0, 64], sizes = [8, 32], strides = [1, 1]} : vector<8x96xf32> to vector<8x32xf32>
    %13 = vector.shape_cast %10 : vector<8x32xf32> to vector<8x4x8xf32>
    %14 = tpu.transpose %13, [1, 0, 2] : vector<8x4x8xf32> -> vector<4x8x8xf32>
    %15 = arith.truncf %14 : vector<4x8x8xf32> to vector<4x8x8xbf16>
    %c0_7 = arith.constant 0 : index
    %c0_8 = arith.constant 0 : index
    %c0_9 = arith.constant 0 : index
    %c0_10 = arith.constant 0 : index
    %16 = vector.load %arg5[%c0_7, %c0_8, %c0_9, %c0_10] : memref<1x4x8x8xbf16, #tpu.memory_space<vmem>>, vector<1x4x8x8xbf16>
    %17 = vector.shape_cast %16 : vector<1x4x8x8xbf16> to vector<4x8x8xbf16>
    %18 = vector.shape_cast %15 : vector<4x8x8xbf16> to vector<1x4x8x8xbf16>
    tpu.vector_store %arg5[%c0_7, %c0_8, %c0_9, %c0_10], %18 {strides = array<i32>} : memref<1x4x8x8xbf16, #tpu.memory_space<vmem>>, vector<1x4x8x8xbf16>,
    %19 = vector.shape_cast %11 : vector<8x32xf32> to vector<8x4x8xf32>
    %20 = tpu.transpose %19, [1, 0, 2] : vector<8x4x8xf32> -> vector<4x8x8xf32>
    %21 = arith.truncf %20 : vector<4x8x8xf32> to vector<4x8x8xbf16>
    %c0_11 = arith.constant 0 : index
    %c0_12 = arith.constant 0 : index
    %c0_13 = arith.constant 0 : index
    %c0_14 = arith.constant 0 : index
    %22 = vector.load %arg6[%c0_11, %c0_12, %c0_13, %c0_14] : memref<1x4x8x8xbf16, #tpu.memory_space<vmem>>, vector<1x4x8x8xbf16>
    %23 = vector.shape_cast %22 : vector<1x4x8x8xbf16> to vector<4x8x8xbf16>
    %24 = vector.shape_cast %21 : vector<4x8x8xbf16> to vector<1x4x8x8xbf16>
    tpu.vector_store %arg6[%c0_11, %c0_12, %c0_13, %c0_14], %24 {strides = array<i32>} : memref<1x4x8x8xbf16, #tpu.memory_space<vmem>>, vector<1x4x8x8xbf16>,
    %25 = vector.shape_cast %12 : vector<8x32xf32> to vector<8x4x8xf32>
    %26 = tpu.transpose %25, [1, 0, 2] : vector<8x4x8xf32> -> vector<4x8x8xf32>
    %27 = arith.truncf %26 : vector<4x8x8xf32> to vector<4x8x8xbf16>
    %c0_15 = arith.constant 0 : index
    %c0_16 = arith.constant 0 : index
    %c0_17 = arith.constant 0 : index
    %c0_18 = arith.constant 0 : index
    %28 = vector.load %arg7[%c0_15, %c0_16, %c0_17, %c0_18] : memref<1x4x8x8xbf16, #tpu.memory_space<vmem>>, vector<1x4x8x8xbf16>
    %29 = vector.shape_cast %28 : vector<1x4x8x8xbf16> to vector<4x8x8xbf16>
    %30 = vector.shape_cast %27 : vector<4x8x8xbf16> to vector<1x4x8x8xbf16>
    tpu.vector_store %arg7[%c0_15, %c0_16, %c0_17, %c0_18], %30 {strides = array<i32>} : memref<1x4x8x8xbf16, #tpu.memory_space<vmem>>, vector<1x4x8x8xbf16>,
    return
  }
  func.func @transform_0(%arg0: i32, %arg1: i32) -> (i32, i32, i32) {
    %c0_i32 = arith.constant 0 : i32
    %c0_i32_0 = arith.constant 0 : i32
    return %arg0, %arg1, %c0_i32 : i32, i32, i32
  }
  func.func @transform_1(%arg0: i32, %arg1: i32) -> (i32, i32) {
    %c0_i32 = arith.constant 0 : i32
    %c0_i32_0 = arith.constant 0 : i32
    %c0_i32_1 = arith.constant 0 : i32
    return %c0_i32, %c0_i32_0 : i32, i32
  }
  func.func @transform_2(%arg0: i32, %arg1: i32) -> (i32, i32) {
    %c0_i32 = arith.constant 0 : i32
    %c0_i32_0 = arith.constant 0 : i32
    %c0_i32_1 = arith.constant 0 : i32
    return %c0_i32, %c0_i32_0 : i32, i32
  }
  func.func @transform_3(%arg0: i32, %arg1: i32) -> (i32, i32, i32, i32) {
    %c0_i32 = arith.constant 0 : i32
    %c0_i32_0 = arith.constant 0 : i32
    %c0_i32_1 = arith.constant 0 : i32
    return %arg0, %c0_i32, %arg1, %c0_i32_0 : i32, i32, i32, i32
  }
  func.func @transform_4(%arg0: i32, %arg1: i32) -> (i32, i32, i32, i32) {
    %c0_i32 = arith.constant 0 : i32
    %c0_i32_0 = arith.constant 0 : i32
    %c0_i32_1 = arith.constant 0 : i32
    return %arg0, %c0_i32, %arg1, %c0_i32_0 : i32, i32, i32, i32
  }
  func.func @transform_5(%arg0: i32, %arg1: i32) -> (i32, i32, i32, i32) {
    %c0_i32 = arith.constant 0 : i32
    %c0_i32_0 = arith.constant 0 : i32
    %c0_i32_1 = arith.constant 0 : i32
    return %arg0, %c0_i32, %arg1, %c0_i32_0 : i32, i32, i32, i32
  }
}

</mosaic_0001>

<bundles_post_ra>
// kernel: tpu_custom_call.1
= control target key start
LH: loop header
LB: loop body
LE: loop exit
PB: predicated region body
PF: predicated region fallthrough
CT: control target
= control target key end

     0   :  { %s1803_s0 = inlined_call_operand.hbm [shape: f32[2,16,32], index: 0, kind: input, shape index: {}]   ;;  %s1804_s1 = inlined_call_operand.hbm [shape: bf16[32,96], index: 1, kind: input, shape index: {}]   ;;  %s1805_s2 = inlined_call_operand.vmem [shape: f32[1,96], index: 2, kind: input, shape index: {}]   ;;  %s1806_s3 = inlined_call_operand.vmem [shape: bf16[2,4,16,8], index: 3, kind: output, shape index: {0}]   ;;  %s1807_s4 = inlined_call_operand.vmem [shape: bf16[2,4,16,8], index: 4, kind: output, shape index: {1}]   ;;  %s1808_s5 = inlined_call_operand.vmem [shape: bf16[2,4,16,8], index: 5, kind: output, shape index: {2}]  }
   0x1   :  { %1814 = sst [smem:[#allocation12_spill]] %s1804_s1 }
   0x2   :  { %1815 = sst [smem:[#allocation13_spill]] %s1807_s4 }
   0x3   :  { %1816 = sst [smem:[#allocation14_spill]] %s1808_s5 }
   0x4   :  { %11 = vsyncpa [#allocation3], 0 }
   0x5   :  { %13 = vsyncpa [#allocation3 + $0x1], 0 }
   0x6   :  { %14 = vsyncpa [#allocation5], 0  ;;  %s1478_s18 = smov 0   ;;  %s1480_s19 = smov 0  }
   0x7   :  { %s1482_s20 = smov 0   ;;  %s1484_s21 = smov 0  }
   0x8   :  { %s1486_s22 = smov 0   ;;  %s1488_s23 = smov 0  }
   0x9   :  { %s1490_s24 = smov 0   ;;  %s1492_s25 = smov 0  }
   0xa LB: > { %s1164_s26 = sadd.s32 4294967295, %s1433_s25   ;;  %p54_p0 = scmp.ne.s32.totalorder %s1409_s19, %s1405_s18  ;;  %s1433_s25 = sphi %s1492_s25, %s20_s25   ;;  %s1429_s24 = sphi %s1490_s24, %s1838_s24   ;;  %s1425_s23 = sphi %s1488_s23, %s1837_s23   ;;  %s1421_s22 = sphi %s1486_s22, %s1836_s22   ;;  %s1417_s21 = sphi %s1484_s21, %s1835_s21   ;;  %s1413_s20 = sphi %s1482_s20, %s1834_s20   ;;  %s1409_s19 = sphi %s1480_s19, %s1833_s19   ;;  %s1405_s18 = sphi %s1478_s18, %s1832_s18  }
   0xb   : > { %p1520_p1 = scmp.eq.s32.totalorder %s1164_s26, 0  ;;  %p1166_p2 = scmp.ge.s32.totalorder %s1433_s25, 1 }
   0xc   : > { %p191_p3 = scmp.lt.s32.totalorder %s1433_s25, 5  ;;  %s1435_s30 = smov [#allocation4]  }
   0xd   : > { %s1817_s27 = scalar_select %p1520_p1, 1, 0 }
   0xe   : > { %p1528_p4 = por %p1520_p1, %p54_p0  ;;  %p1532_p5 = pnand %p1166_p2, %p191_p3 }
   0xf   : > { %s203_s6 = sshll.u32 %s1435_s30, 4  ;;  %s1821_s1 = sld [smem:[#allocation12_spill]]  ;;  %s204_s6 = int_to_ptr.vmem [resolvable:$true] %s203_s6 }
  0x10   : > { %s1818_s28 = scalar_select %p1528_p4, 1, 0 }
  0x11   : > { %s1819_s29 = scalar_select %p1532_p5, 1, 0 }
  0x12   : > { %p1216_p6 = pneg %p1532_p5 }
  0x14   : > { %p1540_p7 = pnand %p1216_p6, %p1520_p1 }
  0x15   : > { %s1305_s10 = scalar_lea.hbm %s1821_s1, 256 }
  0x16   : > { %p1306_p8 = scmp.ne.s32.totalorder %s1821_s1, %s1305_s10  ;;  %p1307_p9 = pneg %p1540_p7 }
  0x17   : > { %p1312_p12 = scmp.lt.u32.totalorder %s1305_s10, %s1821_s1 }
  0x18   : > { %p1308_p10 = pnand %p1307_p9, %p1306_p8 }
  0x1a   : > { %p1309_p11 = pneg %p1308_p10 }
  0x1c   : > { %p1314_p13 = pnand %p1312_p12, %p1309_p11 }
  0x1e   : > { %1317 = shalt.err (!%p1314_p13)
}
  0x1f   : > { %s1318_s15 = scalar_lea.vmem %s204_s6, 256  ;;  %p1326_p6 = scmp.lt.s32.totalorder %s204_s6, %s204_s6 }
  0x20   : > { %p1319_p0 = scmp.ne.s32.totalorder %s204_s6, %s1318_s15  ;;  %p1327_p1 = scmp.lt.s32.totalorder %s1318_s15, %s1318_s15 }
  0x22   : > { %p1321_p2 = pnand %p1319_p0, %p1307_p9  ;;  %p1328_p4 = por %p1327_p1, %p1326_p6 }
  0x24   : > { %p1322_p3 = pneg %p1321_p2 }
  0x26   : > { %p1329_p5 = pnand %p1328_p4, %p1322_p3 }
  0x28   : > { %1332 = shalt.err (!%p1329_p5)
}
  0x29   : > { %s1436_s16 = smov 64   ;;  %s1437_s17 = smov 4  }
  0x2a   : > { %1219 = dma.hbm_to_vmem [thread:$0]  (!%p1540_p7), %s1821_s1, 256, %s204_s6, [#allocation5], %s1436_s16, %s1436_s16, %s1437_s17  }
  0x2b   : > { %p122_p1 = scmp.eq.s32.totalorder %s1164_s26, 3  ;;  %s29_s8 = sadd.s32 1, %s1425_s23 }
  0x2c   : > { %p30_p4 = scmp.ge.s32.totalorder %s29_s8, 2  ;;  %s32_s9 = sadd.s32 1, %s1429_s24 }
  0x2d   : > { %p48_p5 = scmp.ne.s32.totalorder %s1413_s20, %s1409_s19  ;;  %p49_p8 = scmp.eq.s32.totalorder %s1433_s25, 0 }
  0x2e   : > { %s1840_s8 = smov (%p30_p4, %s29_s8), 0  ;;  %s1842_s9 = smov (!%p30_p4, %s32_s9), %s1429_s24 }
  0x2f   : > { %1822 = sst [smem:[#allocation11_spill]] %s1840_s8  ;;  %s37_s7 = ssub.s32 %s1425_s23, %s1840_s8 }
  0x30   : > { %s41_s10 = sadd.s32 1, %s1413_s20  ;;  %p34_p9 = scmp.ge.s32.totalorder %s1842_s9, 2 }
  0x31   : > { %p1573_p7 = por %p122_p1, %p48_p5  ;;  %p1577_p10 = por %p49_p8, %p48_p5 }
  0x32   : > { %s220_s11 = sand.u32 1, %s1413_s20   ;;  %s1844_s9 = smov (%p34_p9, %s1842_s9), 0 }
  0x33   : > { %p1225_p11 = scmp.lt.s32.totalorder %s1433_s25, 4  ;;  %s1169_s12 = sshll.u32 %s220_s11, 3 }
  0x34   : > { %s36_s13 = ssub.s32 %s1429_s24, %s1844_s9  ;;  %s1170_s15 = sshll.u32 %s1429_s24, 1 }
  0x35   : > { %s38_s14 = sor.u32 %s37_s7, %s36_s13  ;;  %s229_s16 = sadd.s32 %s1425_s23, %s1170_s15 }
  0x36   : > { %p39_p12 = scmp.eq.s32.totalorder %s38_s14, 0  ;;  %s1171_s17 = sshll.u32 %s229_s16, 7 }
  0x37   : > { %s224_s18 = scalar_lea.vmem [#allocation2], %s1169_s12  ;;  %s1595_s4 = scalar_lea.hbm %s1803_s0, %s1171_s17 }
  0x38   : > { %s233_s30 = sshll.u32 %s224_s18, 4  ;;  %p1603_p13 = pnand %p1225_p11, %p1577_p10  ;;  %s1597_s30 = int_to_ptr.vmem [resolvable:$true] %s233_s30 }
  0x39   : > { %s1590_s1 = scalar_select %p39_p12, %s1413_s20, %s41_s10  }
  0x3a   : > { %s221_s10 = scalar_lea.sflag [#allocation3], %s220_s11  ;;  %s1333_s12 = scalar_lea.hbm %s1595_s4, 128 }
  0x3b   : > { %p1334_p0 = scmp.ne.s32.totalorder %s1595_s4, %s1333_s12  ;;  %p1335_p2 = pneg %p1603_p13 }
  0x3c   : > { %s1338_s26 = scalar_lea.hbm %s1803_s0, 512  ;;  %p1339_p1 = scmp.lt.u32.totalorder %s1595_s4, %s1803_s0 }
  0x3d   : > { %p1336_p3 = pnand %p1335_p2, %p1334_p0  ;;  %p1340_p4 = scmp.lt.u32.totalorder %s1338_s26, %s1333_s12 }
  0x3e   : > { %p1342_p8 = scmp.lt.u32.totalorder %s1333_s12, %s1595_s4 }
  0x3f   : > { %p1337_p6 = pneg %p1336_p3  ;;  %p1341_p5 = por %p1340_p4, %p1339_p1 }
  0x41   : > { %p1343_p9 = por %p1342_p8, %p1341_p5 }
  0x43   : > { %p1344_p10 = pnand %p1343_p9, %p1337_p6 }
  0x45   : > { %1347 = shalt.err (!%p1344_p10)
}
  0x46   : > { %s1348_s11 = scalar_lea.vmem %s1597_s30, 128  ;;  %s1438_s15 = smov [#allocation2]  }
  0x47   : > { %p1349_p11 = scmp.ne.s32.totalorder %s1597_s30, %s1348_s11  ;;  %s1353_s16 = sshll.u32 %s1438_s15, 4  ;;  %s1354_s16 = int_to_ptr.vmem [resolvable:$false] %s1353_s16 }
  0x48   : > { %s1355_s17 = scalar_lea.vmem %s1354_s16, 256  ;;  %p1356_p3 = scmp.lt.s32.totalorder %s1597_s30, %s1354_s16 }
  0x49   : > { %p1351_p12 = pnand %p1349_p11, %p1335_p2  ;;  %p1357_p1 = scmp.lt.s32.totalorder %s1355_s17, %s1348_s11 }
  0x4b   : > { %p1352_p0 = pneg %p1351_p12  ;;  %p1358_p4 = por %p1357_p1, %p1356_p3 }
  0x4d   : > { %p1359_p5 = pnand %p1358_p4, %p1352_p0 }
  0x4f   : > { %1362 = shalt.err (!%p1359_p5)
}
  0x50   : > { %1223 = dma.hbm_to_vmem [thread:$0]  (!%p1603_p13), %s1595_s4, 128, %s1597_s30, %s221_s10  }
  0x51   : > { %p1826_p6 = scmp.ne.s32.totalorder %s1819_s29, 0 }
  0x52   : > { %s1635_s18 = sand.u32 (!%p1826_p6), 1, %s1409_s19   ;;  %p1827_p2 = scmp.ne.s32.totalorder (!%p1826_p6), %s1818_s28, 0 }
  0x53   : > { %242 = sbr.rel (%p1826_p6) target bundleno = 602 (0x25a), region = 32  ;;  %s1173_s12 = sshll.u32 (!%p1826_p6), %s1635_s18, 3 }
  0x54   : > { %s245_s5 = scalar_lea.sflag (!%p1826_p6), [#allocation3], %s1635_s18  ;;  %s248_s8 = scalar_lea.vmem (!%p1826_p6), [#allocation2], %s1173_s12 }
  0x5a   : > { %1396 = dma.done.wait (%p1827_p2), %s245_s5, 128  }
  0x5b   : > { %1398 = vsyncadd (%p1827_p2), %s245_s5, 4294967168  ;;  %p1828_p8 = scmp.ne.s32.totalorder %s1817_s27, 0 }
  0x5d   : > { %1400 = dma.done.wait (%p1828_p8), [#allocation5], 256  }
  0x5e   : > { %1402 = vsyncadd (%p1828_p8), [#allocation5], 4294967040  ;;  %v1439_v0 = vmov 0.0   ;;  %vm1440_vm0 = vmmov 0   ;;  %v1303_v1 = vld [vmem:[#allocation4] sm:$0xff]   ;;  %v1304_v2 = vld [vmem:[#allocation4 + $0x8] sm:$0xff]   ;;  %v372_v18 = vlaneseq }
  0x5f   : > { %1202 = vmatprep.subr.bf16.mxu0 %v1439_v0  ;;  %1206 = vmatprep.mubr.msk.bf16.mxu0 %vm1440_vm0, %v1439_v0  ;;  %v287_v3 = vld [vmem:[%s248_s8] sm:$0xff]  ;;  %vm312_vm1 = vcmask 261120   ;;  %s1441_s27 = smov 104   ;;  %s1442_s29 = smov 120   ;;  %v1446_v16 = vmov 1983009808  }
  0x60   : > { %1203 = vmatpush3.bf16.msra.mxu0 %v1303_v1  ;;  %v288_v4 = vpack.c.bf16 %v287_v3, %v287_v3  ;;  %v1178_v5 = vld [vmem:[%s1805_s2] ss:$0 sm:$0xff]  ;;  %s1443_s30 = smov 112   ;;  %s1444_s7 = smov 96   ;;  %v370_v17 = vunpack.c.l.s4 %v1446_v16  ;;  %v1447_v20 = vmov 1934713408  }
  0x61   : > { %1204 = vmatprep.subr.bf16.mxu0 %v1439_v0  ;;  %s1445_s10 = smov 64   ;;  %v402_v21 = vunpack.c.l.s4 %v1447_v20  ;;  %v373_v23 = vshrl.u32 %v372_v18, 7  ;;  %s1671_s26 = sshll.u32 %s1635_s18, 4  ;;  %vm507_vm2 = vcmask 60416  }
  0x62   : > { %v371_v22 = vunpack.c.0.s8 %v370_v17  ;;  %s1678_s13 = scalar_lea.vmem [#allocation6], %s1671_s26  ;;  %s1721_s14 = scalar_lea.vmem [#allocation7], %s1671_s26 }
  0x63   : > { %v403_v26 = vunpack.c.0.s8 %v402_v21  ;;  %s1736_s11 = scalar_lea.vmem [#allocation8], %s1671_s26  ;;  %s1191_s15 = sshll.u32 (%p1573_p7), %s1421_s22, 3 }
  0x64   : > { %1205 = vmatpush3.bf16.msra.mxu0 %v1304_v2  ;;  %v1654_v27 = vsub.s32 %v371_v22, %v373_v23  ;;  %s847_s16 = sadd.s32 (%p1573_p7), %s1417_s21, %s1191_s15 }
  0x65   : > { %v1656_v33 = vsub.s32 %v403_v26, %v373_v23  ;;  %s1192_s17 = sshll.u32 (%p1573_p7), %s847_s16, 2 }
  0x66   : > { %s849_s5 = scalar_lea.vmem (%p1573_p7), %s1806_s3, %s1192_s17 }
  0x67   : > { %1207 = vmatmul.mubr.msk.bf16.vlgmr.msra.gmra.mrb[0].mxu0 %vm312_vm1, %v288_v4 }
 0x13a   : > { %v350_v6 = vpop.f32.mrb[0].mxu0 }
 0x13b   : > { %v351_v7 = vadd.f32 %v1178_v5, %v350_v6  ;;  %v1208_v8 = vpop.f32.mrb[1].mxu0 }
 0x13c   : > { %v353_v9 = vpop.f32.mrb[2].mxu0 }
 0x13d   : > { %517 = vrot.lane.b32.xlu1 %v351_v7, %s1441_s27  ;;  %513 = vrot.lane.b32.xlu0 %v351_v7, %s1442_s29  ;;  %v1209_v10 = vpop.f32.mrb[3].mxu0  ;;  %v356_v11 = vmul.f32 0.5100697, %v351_v7 }
 0x141   : > { %515 = vrot.lane.b32.xlu0 %v351_v7, %s1443_s30  ;;  %358 = vrot.lane.b32.xlu1 %v356_v11, %s1442_s29 }
 0x145   : > { %519 = vrot.lane.b32.xlu0 %v351_v7, %s1444_s7  ;;  %364 = vrot.lane.b32.xlu1 %v356_v11, %s1441_s27 }
 0x149   : > { %675 = vrot.lane.b32.xlu0 %v351_v7, %s1445_s10 }
 0x14d   : > { %361 = vrot.lane.b32.xlu0 %v356_v11, %s1443_s30 }
 0x1af   : > { %v518_v12 = vpop.permute.xlu1 %517  ;;  %v514_v13 = vpop.permute.xlu0 %513 }
 0x1b0   : > { %521 = vrot.lane.b32.xlu1 %v514_v13, %s1444_s7 }
 0x1b3   : > { %v516_v14 = vpop.permute.xlu0 %515  ;;  %v359_v15 = vpop.permute.xlu1 %358 }
 0x1b4   : > { %523 = vrot.lane.b32.xlu0 %v516_v14, %s1444_s7  ;;  %525 = vrot.lane.b32.xlu1 %v518_v12, %s1444_s7 }
 0x1b7   : > { %v1650_v19 = vpop.permute.xlu0 %519  ;;  %v365_v24 = vpop.permute.xlu1 %364 }
 0x1b8   : > { %679 = vrot.lane.b32.xlu0 %v516_v14, %s1445_s10  ;;  %677 = vrot.lane.b32.xlu1 %v514_v13, %s1445_s10  ;;  %v383_v28 = vcombine.low %v359_v15, %v365_v24  ;;  %v384_v29 = vcombine.high %v359_v15, %v365_v24 }
 0x1ba   : > { %v391_v34 = vrot.slane %v383_v28, %v1654_v27  ;;  %v398_v35 = vrot.slane %v384_v29, %v1654_v27 }
 0x1bb   : > { %v1652_v25 = vpop.permute.xlu0 %675 }
 0x1bc   : > { %681 = vrot.lane.b32.xlu1 %v518_v12, %s1445_s10 }
 0x1bf   : > { %v362_v30 = vpop.permute.xlu0 %361 }
 0x1c0   : > { %v367_v31 = vcombine.low %v356_v11, %v362_v30  ;;  %v368_v32 = vcombine.high %v356_v11, %v362_v30 }
 0x1c2   : > { %v375_v36 = vrot.slane %v367_v31, %v1654_v27  ;;  %v382_v37 = vrot.slane %v368_v32, %v1654_v27 }
 0x1c4   : > { %v399_v38 = vcombine.low %v375_v36, %v391_v34  ;;  %v400_v39 = vcombine.high %v375_v36, %v391_v34  ;;  %v415_v40 = vcombine.low %v382_v37, %v398_v35  ;;  %v416_v41 = vcombine.high %v382_v37, %v398_v35 }
 0x1c6   : > { %v407_v42 = vrot.slane %v399_v38, %v1656_v33  ;;  %v414_v43 = vrot.slane %v400_v39, %v1656_v33  ;;  %v423_v44 = vrot.slane %v415_v40, %v1656_v33  ;;  %v430_v45 = vrot.slane %v416_v41, %v1656_v33 }
 0x1c8   : > { %v435_v46 = vcombine.low %v407_v42, %v414_v43  ;;  %v1182_v47 = vcombine.high %v407_v42, %v414_v43  ;;  %v451_v48 = vcombine.low %v423_v44, %v430_v45  ;;  %v1183_v49 = vcombine.high %v423_v44, %v430_v45 }
 0x1ca   : > { %v442_v50 = vrot.slane %v435_v46, %v1654_v27  ;;  %v450_v51 = vrot.slane %v1182_v47, %v1654_v27  ;;  %v458_v52 = vrot.slane %v451_v48, %v1654_v27  ;;  %v466_v53 = vrot.slane %v1183_v49, %v1654_v27 }
 0x1cc   : > { %v467_v54 = vcombine.low %v442_v50, %v450_v51  ;;  %v468_v55 = vcombine.high %v442_v50, %v450_v51  ;;  %v483_v56 = vcombine.low %v458_v52, %v466_v53  ;;  %v484_v57 = vcombine.high %v458_v52, %v466_v53 }
 0x1ce   : > { %v475_v58 = vrot.slane %v467_v54, %v1656_v33  ;;  %v482_v59 = vrot.slane %v468_v55, %v1656_v33  ;;  %v491_v60 = vrot.slane %v483_v56, %v1656_v33  ;;  %v498_v61 = vrot.slane %v484_v57, %v1656_v33 }
 0x1d0   : > { %v499_v62 = vcombine.low %v475_v58, %v491_v60  ;;  %v500_v63 = vcombine.high %v475_v58, %v491_v60  ;;  %v501_v0 = vcombine.low %v482_v59, %v498_v61  ;;  %v502_v1 = vcombine.high %v482_v59, %v498_v61 }
 0x1d2   : > { %v503_v2 = vpack.c.bf16 %v499_v62, %v499_v62  ;;  %v504_v3 = vpack.c.bf16 %v500_v63, %v500_v63  ;;  %v505_v4 = vpack.c.bf16 %v501_v0, %v501_v0  ;;  %v506_v5 = vpack.c.bf16 %v502_v1, %v502_v1 }
 0x1d4   : > { %508 = vst.msk [vmem:[%s1678_s13] sm:$0xf] %vm507_vm2, %v503_v2  ;;  %509 = vst.msk [vmem:[%s1678_s13 + $0x4] sm:$0xf] %vm507_vm2, %v504_v3 }
 0x1d5   : > { %510 = vst.msk [vmem:[%s1678_s13 + $0x8] sm:$0xf] %vm507_vm2, %v505_v4  ;;  %511 = vst.msk [vmem:[%s1678_s13 + $0xc] sm:$0xf] %vm507_vm2, %v506_v5 }
 0x222   : > { %v522_v6 = vpop.permute.xlu1 %521 }
 0x226   : > { %v524_v7 = vpop.permute.xlu0 %523  ;;  %v526_v8 = vpop.permute.xlu1 %525 }
 0x227   : > { %v531_v9 = vcombine.low %v1650_v19, %v524_v7  ;;  %v532_v10 = vcombine.high %v1650_v19, %v524_v7  ;;  %v547_v11 = vcombine.low %v522_v6, %v526_v8  ;;  %v548_v12 = vcombine.high %v522_v6, %v526_v8 }
 0x229   : > { %v539_v13 = vrot.slane %v531_v9, %v1654_v27  ;;  %v546_v14 = vrot.slane %v532_v10, %v1654_v27  ;;  %v555_v15 = vrot.slane %v547_v11, %v1654_v27  ;;  %v562_v16 = vrot.slane %v548_v12, %v1654_v27 }
 0x22a   : > { %v678_v17 = vpop.permute.xlu1 %677  ;;  %v680_v23 = vpop.permute.xlu0 %679 }
 0x22b   : > { %v563_v18 = vcombine.low %v539_v13, %v555_v15  ;;  %v564_v20 = vcombine.high %v539_v13, %v555_v15  ;;  %v579_v21 = vcombine.low %v546_v14, %v562_v16  ;;  %v580_v22 = vcombine.high %v546_v14, %v562_v16 }
 0x22c   : > { %v687_v29 = vcombine.low %v1652_v25, %v680_v23  ;;  %v688_v30 = vcombine.high %v1652_v25, %v680_v23 }
 0x22d   : > { %v571_v24 = vrot.slane %v563_v18, %v1656_v33  ;;  %v578_v19 = vrot.slane %v564_v20, %v1656_v33  ;;  %v587_v26 = vrot.slane %v579_v21, %v1656_v33  ;;  %v594_v28 = vrot.slane %v580_v22, %v1656_v33 }
 0x22e   : > { %v682_v31 = vpop.permute.xlu1 %681  ;;  %v695_v43 = vrot.slane %v687_v29, %v1654_v27  ;;  %v702_v44 = vrot.slane %v688_v30, %v1654_v27 }
 0x22f   : > { %v599_v32 = vcombine.low %v571_v24, %v578_v19  ;;  %v1184_v34 = vcombine.high %v571_v24, %v578_v19  ;;  %v615_v35 = vcombine.low %v587_v26, %v594_v28  ;;  %v1185_v36 = vcombine.high %v587_v26, %v594_v28 }
 0x230   : > { %v703_v37 = vcombine.low %v678_v17, %v682_v31  ;;  %v704_v38 = vcombine.high %v678_v17, %v682_v31  ;;  %v867_v31 = vld [vmem:[%s1678_s13 + $0x4] sm:$0xf] (%p1573_p7) }
 0x231   : > { %v606_v39 = vrot.slane %v599_v32, %v1654_v27  ;;  %v614_v40 = vrot.slane %v1184_v34, %v1654_v27  ;;  %v622_v41 = vrot.slane %v615_v35, %v1654_v27  ;;  %v630_v42 = vrot.slane %v1185_v36, %v1654_v27  ;;  %v869_v32 = vld [vmem:[%s1678_s13 + $0x8] sm:$0xf] (%p1573_p7)  ;;  %v871_v34 = vld [vmem:[%s1678_s13 + $0xc] sm:$0xf] (%p1573_p7)  ;;  %868 = vst [vmem:[%s849_s5 + $0x8] sm:$0xf] (%p1573_p7), %v867_v31 }
 0x232   : > { %v711_v25 = vrot.slane %v703_v37, %v1654_v27  ;;  %v718_v45 = vrot.slane %v704_v38, %v1654_v27  ;;  %870 = vst [vmem:[%s849_s5 + $0x10] sm:$0xf] (%p1573_p7), %v869_v32  ;;  %872 = vst [vmem:[%s849_s5 + $0x18] sm:$0xf] (%p1573_p7), %v871_v34 }
 0x233   : > { %v631_v46 = vcombine.low %v606_v39, %v614_v40  ;;  %v632_v47 = vcombine.high %v606_v39, %v614_v40  ;;  %v647_v48 = vcombine.low %v622_v41, %v630_v42  ;;  %v648_v49 = vcombine.high %v622_v41, %v630_v42 }
 0x234   : > { %v719_v50 = vcombine.low %v695_v43, %v711_v25  ;;  %v720_v51 = vcombine.high %v695_v43, %v711_v25  ;;  %v735_v52 = vcombine.low %v702_v44, %v718_v45  ;;  %v736_v53 = vcombine.high %v702_v44, %v718_v45 }
 0x235   : > { %v639_v54 = vrot.slane %v631_v46, %v1656_v33  ;;  %v646_v55 = vrot.slane %v632_v47, %v1656_v33  ;;  %v655_v56 = vrot.slane %v647_v48, %v1656_v33  ;;  %v662_v57 = vrot.slane %v648_v49, %v1656_v33 }
 0x236   : > { %v727_v58 = vrot.slane %v719_v50, %v1656_v33  ;;  %v734_v59 = vrot.slane %v720_v51, %v1656_v33  ;;  %v743_v60 = vrot.slane %v735_v52, %v1656_v33  ;;  %v750_v61 = vrot.slane %v736_v53, %v1656_v33 }
 0x237   : > { %v663_v62 = vcombine.low %v639_v54, %v655_v56  ;;  %v664_v63 = vcombine.high %v639_v54, %v655_v56  ;;  %v665_v0 = vcombine.low %v646_v55, %v662_v57  ;;  %v666_v1 = vcombine.high %v646_v55, %v662_v57 }
 0x238   : > { %v755_v2 = vcombine.low %v727_v58, %v734_v59  ;;  %v1186_v3 = vcombine.high %v727_v58, %v734_v59  ;;  %v771_v4 = vcombine.low %v743_v60, %v750_v61  ;;  %v1187_v5 = vcombine.high %v743_v60, %v750_v61 }
 0x239   : > { %v667_v6 = vpack.c.bf16 %v663_v62, %v663_v62  ;;  %v668_v7 = vpack.c.bf16 %v664_v63, %v664_v63  ;;  %v669_v8 = vpack.c.bf16 %v665_v0, %v665_v0  ;;  %v670_v9 = vpack.c.bf16 %v666_v1, %v666_v1 }
 0x23a   : > { %v762_v10 = vrot.slane %v755_v2, %v1654_v27  ;;  %v770_v11 = vrot.slane %v1186_v3, %v1654_v27  ;;  %v778_v12 = vrot.slane %v771_v4, %v1654_v27  ;;  %v786_v13 = vrot.slane %v1187_v5, %v1654_v27 }
 0x23b   : > { %671 = vst.msk [vmem:[%s1721_s14] sm:$0xf] %vm507_vm2, %v667_v6  ;;  %672 = vst.msk [vmem:[%s1721_s14 + $0x4] sm:$0xf] %vm507_vm2, %v668_v7 }
 0x23c   : > { %673 = vst.msk [vmem:[%s1721_s14 + $0x8] sm:$0xf] %vm507_vm2, %v669_v8  ;;  %674 = vst.msk [vmem:[%s1721_s14 + $0xc] sm:$0xf] %vm507_vm2, %v670_v9  ;;  %v787_v14 = vcombine.low %v762_v10, %v770_v11  ;;  %v788_v15 = vcombine.high %v762_v10, %v770_v11  ;;  %v803_v16 = vcombine.low %v778_v12, %v786_v13 }
 0x23d   : > { %v804_v17 = vcombine.high %v778_v12, %v786_v13 }
 0x23e   : > { %v795_v27 = vrot.slane %v787_v14, %v1656_v33  ;;  %v802_v18 = vrot.slane %v788_v15, %v1656_v33  ;;  %v811_v20 = vrot.slane %v803_v16, %v1656_v33 }
 0x23f   : > { %v818_v21 = vrot.slane %v804_v17, %v1656_v33  ;;  %845 = sbr.rel (!%p1573_p7) target bundleno = 582 (0x246), region = 44  ;;  %v865_v33 = vld [vmem:[%s1678_s13] sm:$0xf] (%p1573_p7) }
 0x240   : > { %v819_v22 = vcombine.low %v795_v27, %v811_v20  ;;  %v820_v23 = vcombine.high %v795_v27, %v811_v20  ;;  %866 = vst [vmem:[%s849_s5] sm:$0xf] (%p1573_p7), %v865_v33 }
 0x241   : > { %v821_v24 = vcombine.low %v802_v18, %v818_v21  ;;  %v822_v19 = vcombine.high %v802_v18, %v818_v21 }
 0x242   : > { %v823_v26 = vpack.c.bf16 %v819_v22, %v819_v22  ;;  %v824_v28 = vpack.c.bf16 %v820_v23, %v820_v23 }
 0x243   : > { %v825_v29 = vpack.c.bf16 %v821_v24, %v821_v24  ;;  %v826_v30 = vpack.c.bf16 %v822_v19, %v822_v19 }
 0x244   : > { %827 = vst.msk [vmem:[%s1736_s11] sm:$0xf] %vm507_vm2, %v823_v26  ;;  %828 = vst.msk [vmem:[%s1736_s11 + $0x4] sm:$0xf] %vm507_vm2, %v824_v28 }
 0x245   : > { %829 = vst.msk [vmem:[%s1736_s11 + $0x8] sm:$0xf] %vm507_vm2, %v825_v29  ;;  %830 = vst.msk [vmem:[%s1736_s11 + $0xc] sm:$0xf] %vm507_vm2, %v826_v30 }
 0x246 PF: > { %903 = sbr.rel (!%p1573_p7) target bundleno = 592 (0x250), region = 85  ;;  %s1193_s8 = sshll.u32 (%p1573_p7), %s1421_s22, 3  ;;  %v923_v35 = vld [vmem:[%s1721_s14] sm:$0xf] (%p1573_p7)  ;;  %v925_v36 = vld [vmem:[%s1721_s14 + $0x4] sm:$0xf] (%p1573_p7) }
 0x247   : > { %s905_s4 = sadd.s32 (%p1573_p7), %s1417_s21, %s1193_s8  ;;  %v927_v37 = vld [vmem:[%s1721_s14 + $0x8] sm:$0xf] (%p1573_p7)  ;;  %v929_v38 = vld [vmem:[%s1721_s14 + $0xc] sm:$0xf] (%p1573_p7)  ;;  %s1829_s30 = sld [smem:[#allocation13_spill]] (%p1573_p7) }
 0x248   : > { %s1194_s28 = sshll.u32 (%p1573_p7), %s905_s4, 2 }
 0x24d   : > { %s907_s7 = scalar_lea.vmem %s1829_s30, %s1194_s28 }
 0x24e   : > { %924 = vst [vmem:[%s907_s7] sm:$0xf] %v923_v35  ;;  %926 = vst [vmem:[%s907_s7 + $0x8] sm:$0xf] %v925_v36 }
 0x24f   : > { %928 = vst [vmem:[%s907_s7 + $0x10] sm:$0xf] %v927_v37  ;;  %930 = vst [vmem:[%s907_s7 + $0x18] sm:$0xf] %v929_v38 }
 0x250 PF: > { %961 = sbr.rel (!%p1573_p7) target bundleno = 602 (0x25a), region = 126  ;;  %s1195_s10 = sshll.u32 (%p1573_p7), %s1421_s22, 3  ;;  %v981_v39 = vld [vmem:[%s1736_s11] sm:$0xf] (%p1573_p7)  ;;  %v983_v40 = vld [vmem:[%s1736_s11 + $0x4] sm:$0xf] (%p1573_p7) }
 0x251   : > { %s963_s26 = sadd.s32 (%p1573_p7), %s1417_s21, %s1195_s10  ;;  %v985_v41 = vld [vmem:[%s1736_s11 + $0x8] sm:$0xf] (%p1573_p7)  ;;  %v987_v42 = vld [vmem:[%s1736_s11 + $0xc] sm:$0xf] (%p1573_p7)  ;;  %s1830_s16 = sld [smem:[#allocation14_spill]] (%p1573_p7) }
 0x252   : > { %s1196_s13 = sshll.u32 (%p1573_p7), %s963_s26, 2 }
 0x257   : > { %s965_s17 = scalar_lea.vmem %s1830_s16, %s1196_s13 }
 0x258   : > { %982 = vst [vmem:[%s965_s17] sm:$0xf] %v981_v39  ;;  %984 = vst [vmem:[%s965_s17 + $0x8] sm:$0xf] %v983_v40 }
 0x259   : > { %986 = vst [vmem:[%s965_s17 + $0x10] sm:$0xf] %v985_v41  ;;  %988 = vst [vmem:[%s965_s17 + $0x18] sm:$0xf] %v987_v42 }
 0x25a PF: > { %s20_s25 = sadd.s32 1, %s1433_s25   ;;  %s1831_s6 = sld [smem:[#allocation11_spill]] }
 0x25b   : > { %p17_p7 = scmp.ge.s32.totalorder %s20_s25, 6   ;;  %s1832_s18 = smov %s1409_s19 }
 0x25c   : > { %s1833_s19 = smov %s1413_s20  ;;  %s1834_s20 = smov %s1590_s1 }
 0x25d   : > { %s1835_s21 = smov %s1425_s23  ;;  %s1836_s22 = smov %s1429_s24 }
 0x25e   : > { %s1838_s24 = smov %s1844_s9  ;;  %19 = sbr.rel (!%p17_p7) target bundleno = 10 (0xa), region = 223 }
 0x260   : > { %s1837_s23 = smov %s1831_s6 }
 0x265   :  { %1043 = vsyncpa [#allocation3], 1 }
 0x266   :  { %1045 = vsyncpa [#allocation3 + $0x1], 1 }
 0x267   :  { %1046 = vsyncpa [#allocation5], 1 }

</bundles_post_ra>
